<compile_context>
chip_gen: v5e
topology: v5e:2x2
jax: 0.10.0
libtpu: 0.0.40
codegen_flags: <defaults>
</compile_context>

<pallas_src>
import jax
import jax.numpy as jnp
from jax.experimental import pallas as pl
from jax.experimental.pallas import tpu as pltpu


def residual_linear_kernel(x_ref, w_ref, b_ref, o_ref):
    # x_ref: (TM, D)  w_ref: (D, D)  b_ref: (1, D)  o_ref: (TM, D)
    x = x_ref[...]
    # Hot path: MXU matmul with f32 accumulation.
    y = jnp.dot(x, w_ref[...], preferred_element_type=jnp.float32)
    y = y + b_ref[...].astype(jnp.float32)
    # Residual add in f32 (avoid a redundant cast when x is already f32).
    if x.dtype == jnp.float32:
        res = x + y
    else:
        res = x.astype(jnp.float32) + y
    o_ref[...] = res.astype(o_ref.dtype)


def _choose_token_tile(n_rows, d, x_itemsize, w_bytes, b_bytes):
    """Pick a row-tile TM that keeps the pipelined VMEM footprint small.

    Footprint per grid step ~= 2 * (TM*D) input double-buffer
                              + 2 * (TM*D) output double-buffer
                              + resident W + resident b.
    Budget 12 MiB -> safe under v5e's 16 MiB default scoped VMEM (and trivially
    under v6e/v7x's 32 MiB).
    """
    budget = 12 * 1024 * 1024
    tm = 1024 if x_itemsize <= 2 else 512
    while tm > 8 and (4 * tm * d * x_itemsize + w_bytes + b_bytes) > budget:
        tm //= 2
    # Clamp for small inputs; rows must stay a multiple of 8 (sublane).
    n_pad8 = max(8, ((n_rows + 7) // 8) * 8)
    tm = min(tm, n_pad8)
    return tm, n_pad8


def residual_forward(x, w, b):
    """x: (B, S, D); w: (D, D) stored so that submodule(x) = x @ w + b; b: (D,)."""
    B, S, D = x.shape
    N = B * S
    dtype = x.dtype

    x_item = jnp.dtype(dtype).itemsize
    w_bytes = D * D * jnp.dtype(w.dtype).itemsize
    b_bytes = D * jnp.dtype(b.dtype).itemsize
    # TODO(synk): for very large D (>= ~2048, f32) W no longer fits resident in
    # VMEM; add a K-tiled path with an f32 accumulator scratch instead.
    tm, n_pad = _choose_token_tile(N, D, x_item, w_bytes, b_bytes)
    # Round padded row count up to a whole number of tiles.
    n_pad = ((n_pad + tm - 1) // tm) * tm

    x2 = x.reshape(N, D)
    if n_pad != N:
        x2 = jnp.pad(x2, ((0, n_pad - N), (0, 0)))
    b2 = b.reshape(1, D)

    grid = (n_pad // tm,)
    out2 = pl.pallas_call(
        residual_linear_kernel,
        out_shape=jax.ShapeDtypeStruct((n_pad, D), dtype),
        grid_spec=pl.GridSpec(
            grid=grid,
            in_specs=[
                pl.BlockSpec((tm, D), lambda i: (i, 0)),  # x tiles stream
                pl.BlockSpec((D, D), lambda i: (0, 0)),   # W resident
                pl.BlockSpec((1, D), lambda i: (0, 0)),   # bias resident
            ],
            out_specs=pl.BlockSpec((tm, D), lambda i: (i, 0)),
        ),
        compiler_params=pltpu.CompilerParams(
            dimension_semantics=("parallel",),
        ),
    )(x2, w, b2)

    if n_pad != N:
        out2 = out2[:N]
    return out2.reshape(B, S, D)


if __name__ == "__main__":
    key = jax.random.PRNGKey(0)
    kx, kw, kb, kx2, kw2, kb2 = jax.random.split(key, 6)

    # --- small toy shape consistent with the module (B=2, S=8, D=32) -------
    B, S, D = 2, 8, 32
    x = jax.random.normal(kx, (B, S, D), dtype=jnp.float32)
    # Deterministic "Linear(D, D)" parameters; w_t = W.T of the torch Linear,
    # so submodule(x) = x @ w_t + b.
    w_t = jax.random.normal(kw, (D, D), dtype=jnp.float32) * (1.0 / jnp.sqrt(D))
    b = jax.random.normal(kb, (D,), dtype=jnp.float32) * 0.01

    out = jax.block_until_ready(residual_forward(x, w_t, b))
    ref = x + (x.reshape(-1, D) @ w_t + b).reshape(B, S, D)
    assert jnp.allclose(out, ref, atol=1e-5, rtol=1e-5), "mismatch vs reference (toy shape)"

    # --- lane-dense shape exercising multi-block tiling + row padding -------
    B2, S2, D2 = 2, 550, 128          # N = 1100 -> padded to a multiple of TM
    x_big = jax.random.normal(kx2, (B2, S2, D2), dtype=jnp.float32)
    w_big = jax.random.normal(kw2, (D2, D2), dtype=jnp.float32) * (1.0 / jnp.sqrt(D2))
    b_big = jax.random.normal(kb2, (D2,), dtype=jnp.float32) * 0.01

    out_big = jax.block_until_ready(residual_forward(x_big, w_big, b_big))
    ref_big = x_big + (x_big.reshape(-1, D2) @ w_big + b_big).reshape(B2, S2, D2)
    assert jnp.allclose(out_big, ref_big, atol=1e-4, rtol=1e-4), "mismatch vs reference (tiled shape)"

    print("KERNEL_OK")
</pallas_src>

<mosaic_0001>
module attributes {stable_mosaic.version = 11 : i64} {
  func.func @residual_linear_kernel(%arg0: i32, %arg1: memref<16x32xf32, #tpu.memory_space<vmem>>, %arg2: memref<32x32xf32, #tpu.memory_space<vmem>>, %arg3: memref<1x32xf32, #tpu.memory_space<vmem>>, %arg4: memref<16x32xf32, #tpu.memory_space<vmem>>) attributes {dimension_semantics = [#tpu.dimension_semantics<parallel>], iteration_bounds = array<i64: 1>, scalar_prefetch = 0 : i64, scratch_operands = 0 : i64, tpu.core_type = #tpu.core_type<tc>, window_params = [{transform_indices = @transform_0, window_bounds = array<i64: 16, 32>}, {pipeline_mode = #tpu.pipeline_mode<synchronous>, transform_indices = @transform_1, window_bounds = array<i64: 32, 32>}, {pipeline_mode = #tpu.pipeline_mode<synchronous>, transform_indices = @transform_2, window_bounds = array<i64: 1, 32>}, {transform_indices = @transform_3, window_bounds = array<i64: 16, 32>}]} {
    %c0 = arith.constant 0 : index
    %c0_0 = arith.constant 0 : index
    %0 = vector.load %arg1[%c0, %c0_0] : memref<16x32xf32, #tpu.memory_space<vmem>>, vector<16x32xf32>
    %c0_1 = arith.constant 0 : index
    %c0_2 = arith.constant 0 : index
    %1 = vector.load %arg2[%c0_1, %c0_2] : memref<32x32xf32, #tpu.memory_space<vmem>>, vector<32x32xf32>
    %cst = arith.constant dense<0.000000e+00> : vector<16x32xf32>
    %2 = tpu.matmul %0, %1, %cst {dimension_numbers = #tpu.dot_dimension_numbers<[1], [0], [0], [1], [0, 0, 1, 1], [], []>} : vector<16x32xf32>, vector<32x32xf32>, vector<16x32xf32> -> vector<16x32xf32>
    %c0_3 = arith.constant 0 : index
    %c0_4 = arith.constant 0 : index
    %3 = vector.load %arg3[%c0_3, %c0_4] : memref<1x32xf32, #tpu.memory_space<vmem>>, vector<1x32xf32>
    %4 = vector.broadcast %3 : vector<1x32xf32> to vector<16x32xf32>
    %5 = arith.addf %2, %4 : vector<16x32xf32>
    %6 = arith.addf %0, %5 : vector<16x32xf32>
    %c0_5 = arith.constant 0 : index
    %c0_6 = arith.constant 0 : index
    %7 = vector.load %arg4[%c0_5, %c0_6] : memref<16x32xf32, #tpu.memory_space<vmem>>, vector<16x32xf32>
    tpu.vector_store %arg4[%c0_5, %c0_6], %6 {strides = array<i32>} : memref<16x32xf32, #tpu.memory_space<vmem>>, vector<16x32xf32>,
    return
  }
  func.func @transform_0(%arg0: i32) -> (i32, i32) {
    %c0_i32 = arith.constant 0 : i32
    %c0_i32_0 = arith.constant 0 : i32
    return %arg0, %c0_i32 : i32, i32
  }
  func.func @transform_1(%arg0: i32) -> (i32, i32) {
    %c0_i32 = arith.constant 0 : i32
    %c0_i32_0 = arith.constant 0 : i32
    %c0_i32_1 = arith.constant 0 : i32
    return %c0_i32, %c0_i32_0 : i32, i32
  }
  func.func @transform_2(%arg0: i32) -> (i32, i32) {
    %c0_i32 = arith.constant 0 : i32
    %c0_i32_0 = arith.constant 0 : i32
    %c0_i32_1 = arith.constant 0 : i32
    return %c0_i32, %c0_i32_0 : i32, i32
  }
  func.func @transform_3(%arg0: i32) -> (i32, i32) {
    %c0_i32 = arith.constant 0 : i32
    %c0_i32_0 = arith.constant 0 : i32
    return %arg0, %c0_i32 : i32, i32
  }
}

</mosaic_0001>

<bundles_post_ra>
// kernel: tpu_custom_call.1
= control target key start
LH: loop header
LB: loop body
LE: loop exit
PB: predicated region body
PF: predicated region fallthrough
CT: control target
= control target key end

     0   :  { %8 = vsyncpa [#allocation3], 0  ;;  %s251_s0 = inlined_call_operand.hbm [shape: f32[16,32], index: 0, kind: input, shape index: {}]   ;;  %s252_s1 = inlined_call_operand.hbm [shape: f32[32,32], index: 1, kind: input, shape index: {}]   ;;  %s253_s2 = inlined_call_operand.vmem [shape: f32[1,32], index: 2, kind: input, shape index: {}]   ;;  %s254_s3 = inlined_call_operand.hbm [shape: f32[16,32], index: 3, kind: output, shape index: {}]  }
   0x1   :  { %9 = vsyncpa [#allocation6], 0 }
   0x2   :  { %10 = vsyncpa [#allocation4], 0  ;;  %s15_s14 = sshll.u32 %s251_s0, 4  ;;  %s201_s15 = smov [#allocation2]   ;;  %s16_s14 = int_to_ptr.hbm [resolvable:$true] %s15_s14 }
   0x3   :  { %s17_s16 = sshll.u32 %s201_s15, 4  ;;  %s28_s19 = sshll.u32 %s252_s1, 4  ;;  %s18_s16 = int_to_ptr.vmem [resolvable:$true] %s17_s16  ;;  %s29_s19 = int_to_ptr.hbm [resolvable:$true] %s28_s19 }
   0x4   :  { %s202_s20 = smov 128   ;;  %s203_s21 = smov 8  }
   0x5   :  { %23 = dma.hbm_to_vmem [thread:$0]  %s16_s14, 256, %s18_s16, [#allocation3], %s202_s20, %s202_s20, %s203_s21  }
   0x6   :  { %s204_s22 = smov [#allocation5]  }
   0x7   :  { %s30_s23 = sshll.u32 %s204_s22, 4  ;;  %s31_s23 = int_to_ptr.vmem [resolvable:$true] %s30_s23 }
   0x8   :  { %36 = dma.hbm_to_vmem [thread:$0]  %s29_s19, 512, %s31_s23, [#allocation6], %s202_s20, %s202_s20, %s203_s21  }
   0x9   :  { %195 = dma.done.wait [#allocation3], 256  }
   0xa   :  { %196 = vsyncadd [#allocation3], 4294967040 }
   0xb   :  { %197 = dma.done.wait [#allocation6], 512  }
   0xc   :  { %198 = vsyncadd [#allocation6], 4294966784  ;;  %v52_v0 = vld [vmem:[#allocation5 + $0x18] sm:$0xff]  ;;  %v51_v1 = vld [vmem:[#allocation5 + $0x10] sm:$0xff]  ;;  %vm57_vm0 = vcmask 261120   ;;  %s205_s24 = smov [#allocation7]  }
   0xd   :  { %76 = vmatpush.msra.mxu0 %v52_v0  ;;  %113 = vmatpush.msra.mxu1 %v52_v0  ;;  %v50_v2 = vld [vmem:[#allocation5 + $0x8] sm:$0xff]  ;;  %v49_v3 = vld [vmem:[#allocation5] sm:$0xff]  ;;  %v47_v4 = vld [vmem:[#allocation2] sm:$0xff]  ;;  %s95_s25 = sshll.u32 %s205_s24, 4  ;;  %s97_s28 = sshll.u32 %s254_s3, 4  ;;  %s96_s25 = int_to_ptr.vmem [resolvable:$true] %s95_s25  ;;  %s98_s28 = int_to_ptr.hbm [resolvable:$true] %s97_s28 }
   0xe   :  { %v48_v5 = vld [vmem:[#allocation2 + $0x8] sm:$0xff]  ;;  %v122_v6 = vld [vmem:[%s253_s2] ss:$0 sm:$0xff] }
   0xf   :  { %77 = vmatpush.msra.mxu0 %v51_v1  ;;  %114 = vmatpush.msra.mxu1 %v51_v1 }
  0x11   :  { %78 = vmatpush.msra.mxu0 %v50_v2  ;;  %115 = vmatpush.msra.mxu1 %v50_v2 }
  0x13   :  { %79 = vmatpush.msra.mxu0 %v49_v3  ;;  %116 = vmatpush.msra.mxu1 %v49_v3 }
  0x14   :  { %111 = vmatmul.msk.f32.vlgmr.msra.gmra.mxu0 %vm57_vm0, %v47_v4  ;;  %112 = vmatmul.msk.f32.vlgmr.msra.gmra.mxu1 %vm57_vm0, %v48_v5 }
  0x91   :  { %v81_v7 = vpop.f32.mrf.mxu0  ;;  %v84_v8 = vpop.f32.mrf.mxu1 }
  0x92   :  { %v82_v9 = vadd.f32 %v122_v6, %v81_v7  ;;  %v85_v10 = vadd.f32 %v122_v6, %v84_v8 }
  0x94   :  { %v87_v11 = vadd.f32 %v82_v9, %v47_v4  ;;  %v88_v12 = vadd.f32 %v85_v10, %v48_v5 }
  0x96   :  { %89 = vst.msk [vmem:[#allocation7] sm:$0xff] %vm57_vm0, %v87_v11 }
  0x97   :  { %90 = vst.msk [vmem:[#allocation7 + $0x8] sm:$0xff] %vm57_vm0, %v88_v12 }
  0x98   :  { %103 = dma.vmem_to_hbm [thread:$0]  %s96_s25, 256, %s98_s28, [#allocation4], %s202_s20, %s202_s20, %s203_s21  }
  0x99   :  { %199 = dma.done.wait [#allocation4], 256  }
  0x9a   :  { %200 = vsyncadd [#allocation4], 4294967040 }
  0x9b   :  { %108 = vsyncpa [#allocation3], 1 }
  0x9c   :  { %109 = vsyncpa [#allocation6], 1 }
  0x9d   :  { %110 = vsyncpa [#allocation4], 1 }

</bundles_post_ra>
